<compile_context>
chip_gen: v6e
topology: v6e:2x2x1
jax: 0.10.0
libtpu: 0.0.40
codegen_flags: <defaults>
</compile_context>

<pallas_src>
import functools

import jax
import jax.numpy as jnp
from jax.experimental import pallas as pl
from jax.experimental.pallas import tpu as pltpu

_TB_MAX = 256          # batch tile for large batches (multiple of 8 sublanes)
_BF16_SUBLANE = 16     # bf16 sublane tile -> keeps the W2 slab slice aligned


def _round_up(x, m):
    return ((x + m - 1) // m) * m


# ----------------------------------------------------------------------------
# Fused forward kernel: 3 matmuls + biases + relu/relu/tanh + affine, in VMEM.
# ----------------------------------------------------------------------------
def _policy_fwd_kernel(s_ref, w12_ref, wm_ref, vec_ref, o_ref, *, D, Dr, H, A):
    # Activations are cast to bf16 for native single-pass MXU; acc in f32.
    x = s_ref[...].astype(jnp.bfloat16)

    # Static ref-view slices of the packed bf16 weight slab (zero runtime
    # cost; both sections start at a bf16-tile-aligned sublane offset).
    w1 = w12_ref[0:D, :]          # (D, H)
    w2 = w12_ref[Dr:Dr + H, :]    # (H, H)

    # Packed f32 row vectors: b1 | b2 | b_mean | action_scale | action_bias
    b1 = vec_ref[0:1, 0:H]
    b2 = vec_ref[1:2, 0:H]
    bm = vec_ref[2:3, 0:A]
    scale = vec_ref[3:4, 0:A]
    bias = vec_ref[4:5, 0:A]

    h = jnp.dot(x, w1, preferred_element_type=jnp.float32) + b1
    h = jnp.maximum(h, 0.0)
    h = jnp.dot(h.astype(jnp.bfloat16), w2, preferred_element_type=jnp.float32) + b2
    h = jnp.maximum(h, 0.0)
    m = jnp.dot(h.astype(jnp.bfloat16), wm_ref[...],
                preferred_element_type=jnp.float32) + bm
    o_ref[...] = (jnp.tanh(m) * scale + bias).astype(o_ref.dtype)


def _policy_forward(state, w12, wmt, vecs, *, D, Dr, H, A):
    B = state.shape[0]
    TB = B if B <= _TB_MAX else _TB_MAX
    nb = pl.cdiv(B, TB)
    Vw = vecs.shape[1]
    kernel = functools.partial(_policy_fwd_kernel, D=D, Dr=Dr, H=H, A=A)
    return pl.pallas_call(
        kernel,
        out_shape=jax.ShapeDtypeStruct((B, A), jnp.float32),
        grid=(nb,),
        in_specs=[
            pl.BlockSpec((TB, D), lambda i: (i, 0)),        # state tile
            pl.BlockSpec((Dr + H, H), lambda i: (0, 0)),    # W1^T | W2^T (resident)
            pl.BlockSpec((H, A), lambda i: (0, 0)),         # Wmean^T     (resident)
            pl.BlockSpec((5, Vw), lambda i: (0, 0)),        # packed vecs (resident)
        ],
        out_specs=pl.BlockSpec((TB, A), lambda i: (i, 0)),
        compiler_params=pltpu.CompilerParams(
            dimension_semantics=("parallel",)),
    )(state, w12, wmt, vecs)


# ----------------------------------------------------------------------------
# Model wrapper (mirrors the PyTorch DeterministicPolicy)
# ----------------------------------------------------------------------------
class DeterministicPolicyPallas:
    def __init__(self, num_inputs, num_actions, hidden_dim, action_space=None,
                 key=jax.random.PRNGKey(42)):
        self.num_inputs = num_inputs
        self.num_actions = num_actions
        self.hidden_dim = hidden_dim

        k1, k2, k3 = jax.random.split(key, 3)

        def xavier(k, fan_out, fan_in):
            bound = (6.0 / (fan_in + fan_out)) ** 0.5
            return jax.random.uniform(k, (fan_out, fan_in), jnp.float32,
                                      -bound, bound)

        # PyTorch layout: weight (out, in), bias (out,); weights_init_ -> xavier, bias=0
        w1 = xavier(k1, hidden_dim, num_inputs)
        b1 = jnp.zeros((hidden_dim,), jnp.float32)
        w2 = xavier(k2, hidden_dim, hidden_dim)
        b2 = jnp.zeros((hidden_dim,), jnp.float32)
        wm = xavier(k3, num_actions, hidden_dim)
        bm = jnp.zeros((num_actions,), jnp.float32)

        if action_space is None:
            scale = jnp.ones((num_actions,), jnp.float32)
            bias = jnp.zeros((num_actions,), jnp.float32)
        else:  # action_space given as a (low, high) pair of arrays
            low = jnp.asarray(action_space[0], jnp.float32)
            high = jnp.asarray(action_space[1], jnp.float32)
            scale = (high - low) / 2.0
            bias = (high + low) / 2.0

        # --- Packed, pre-transposed parameters (done once, natural widths) ---
        D, H, A = num_inputs, hidden_dim, num_actions
        Dr = _round_up(D, _BF16_SUBLANE)   # align W2 section to bf16 tile rows
        self._Dr = Dr

        w12 = jnp.zeros((Dr + H, H), jnp.bfloat16)
        w12 = w12.at[:D, :].set(w1.T.astype(jnp.bfloat16))
        w12 = w12.at[Dr:, :].set(w2.T.astype(jnp.bfloat16))
        self._w12 = w12
        self._wmt = wm.T.astype(jnp.bfloat16)              # (H, A)

        Vw = max(H, A)
        vecs = jnp.zeros((5, Vw), jnp.float32)
        vecs = vecs.at[0, :H].set(b1)
        vecs = vecs.at[1, :H].set(b2)
        vecs = vecs.at[2, :A].set(bm)
        vecs = vecs.at[3, :A].set(scale)
        vecs = vecs.at[4, :A].set(bias)
        self._vecs = vecs

        # Unpacked copies for the pure-JAX reference checks.
        self._params_ref = (w1, b1, w2, b2, wm, bm, scale, bias)

        self._forward = jax.jit(self._forward_impl)

    # --- DeterministicPolicy.forward ---
    def _forward_impl(self, state):
        squeeze = state.ndim == 1
        if squeeze:
            state = state[None, :]
        out = _policy_forward(state.astype(jnp.float32),
                              self._w12, self._wmt, self._vecs,
                              D=self.num_inputs, Dr=self._Dr,
                              H=self.hidden_dim, A=self.num_actions)
        return out[0] if squeeze else out

    def forward(self, state):
        return self._forward(state)

    __call__ = forward

    # --- DeterministicPolicy.sample ---
    # Noise is a host-side jax.random draw, not a kernel op.  Matches PyTorch
    # semantics: self.noise is (num_actions,) and broadcast over the batch.
    def sample(self, state, key):
        mean = self.forward(state)
        noise = jnp.clip(0.1 * jax.random.normal(key, (self.num_actions,),
                                                 jnp.float32), -0.25, 0.25)
        return mean + noise, jnp.array(0.0, jnp.float32), mean

    # Pure-JAX reference mirroring the kernel numerics (bf16 weights/activations,
    # f32 accumulation) — used for tight correctness checks.
    def reference_bf16(self, state):
        w1, b1, w2, b2, wm, bm, scale, bias = self._params_ref
        bf = jnp.bfloat16
        x = state.astype(bf)
        h = jnp.dot(x, w1.T.astype(bf), preferred_element_type=jnp.float32) + b1
        h = jnp.maximum(h, 0.0)
        h = jnp.dot(h.astype(bf), w2.T.astype(bf),
                    preferred_element_type=jnp.float32) + b2
        h = jnp.maximum(h, 0.0)
        m = jnp.dot(h.astype(bf), wm.T.astype(bf),
                    preferred_element_type=jnp.float32) + bm
        return jnp.tanh(m) * scale + bias

    # Full-f32 reference (original PyTorch semantics) — loose sanity check of
    # the bf16-weight quantization error.
    def reference(self, state):
        w1, b1, w2, b2, wm, bm, scale, bias = self._params_ref
        hi = jax.lax.Precision.HIGHEST
        x = jnp.maximum(jnp.dot(state, w1.T, precision=hi) + b1, 0.0)
        x = jnp.maximum(jnp.dot(x, w2.T, precision=hi) + b2, 0.0)
        return jnp.tanh(jnp.dot(x, wm.T, precision=hi) + bm) * scale + bias


# ----------------------------------------------------------------------------
if __name__ == "__main__":
    num_inputs, num_actions, hidden_dim = 16, 4, 32
    batch = 2

    policy = DeterministicPolicyPallas(num_inputs, num_actions, hidden_dim,
                                       action_space=None,
                                       key=jax.random.PRNGKey(42))

    state = jax.random.normal(jax.random.PRNGKey(0),
                              (batch, num_inputs), jnp.float32)

    mean = policy.forward(state)
    jax.block_until_ready(mean)
    assert mean.shape == (batch, num_actions), mean.shape

    # Tight check vs a reference with identical numerics (bf16 weights, f32 acc).
    err = float(jnp.max(jnp.abs(mean - policy.reference_bf16(state))))
    assert err < 1e-3, f"max abs error vs bf16 reference: {err}"

    # Loose sanity check vs the full-f32 PyTorch-style reference
    # (bounds the bf16 weight-quantization error).
    err_f32 = float(jnp.max(jnp.abs(mean - policy.reference(state))))
    assert err_f32 < 5e-2, f"max abs error vs f32 reference: {err_f32}"

    # Exercise the batch-tiled grid path (grid=(2,), "parallel" batch axis).
    big_state = jax.random.normal(jax.random.PRNGKey(2),
                                  (512, num_inputs), jnp.float32)
    big_out = policy.forward(big_state)
    jax.block_until_ready(big_out)
    assert big_out.shape == (512, num_actions), big_out.shape
    err_big = float(jnp.max(jnp.abs(big_out - policy.reference_bf16(big_state))))
    assert err_big < 1e-3, f"max abs error (batched) vs bf16 reference: {err_big}"

    # Also exercise sample() once.
    action, logp, m2 = policy.sample(state, jax.random.PRNGKey(1))
    jax.block_until_ready((action, logp, m2))

    print("KERNEL_OK")
</pallas_src>

<mosaic_0001>
module attributes {stable_mosaic.version = 11 : i64} {
  func.func @_policy_fwd_kernel(%arg0: i32, %arg1: memref<2x16xf32, #tpu.memory_space<vmem>>, %arg2: memref<48x32xbf16, #tpu.memory_space<vmem>>, %arg3: memref<32x4xbf16, #tpu.memory_space<vmem>>, %arg4: memref<5x32xf32, #tpu.memory_space<vmem>>, %arg5: memref<2x4xf32, #tpu.memory_space<vmem>>) attributes {dimension_semantics = [#tpu.dimension_semantics<parallel>], iteration_bounds = array<i64: 1>, scalar_prefetch = 0 : i64, scratch_operands = 0 : i64, tpu.core_type = #tpu.core_type<tc>, window_params = [{transform_indices = @transform_0, window_bounds = array<i64: 2, 16>}, {pipeline_mode = #tpu.pipeline_mode<synchronous>, transform_indices = @transform_1, window_bounds = array<i64: 48, 32>}, {pipeline_mode = #tpu.pipeline_mode<synchronous>, transform_indices = @transform_2, window_bounds = array<i64: 32, 4>}, {pipeline_mode = #tpu.pipeline_mode<synchronous>, transform_indices = @transform_3, window_bounds = array<i64: 5, 32>}, {transform_indices = @transform_4, window_bounds = array<i64: 2, 4>}]} {
    %c0 = arith.constant 0 : index
    %c0_0 = arith.constant 0 : index
    %0 = vector.load %arg1[%c0, %c0_0] : memref<2x16xf32, #tpu.memory_space<vmem>>, vector<2x16xf32>
    %1 = arith.truncf %0 : vector<2x16xf32> to vector<2x16xbf16>
    %c0_1 = arith.constant 0 : index
    %c0_2 = arith.constant 0 : index
    %2 = vector.load %arg2[%c0_1, %c0_2] : memref<48x32xbf16, #tpu.memory_space<vmem>>, vector<16x32xbf16>
    %c16 = arith.constant 16 : index
    %c0_3 = arith.constant 0 : index
    %3 = vector.load %arg2[%c16, %c0_3] : memref<48x32xbf16, #tpu.memory_space<vmem>>, vector<32x32xbf16>
    %c0_4 = arith.constant 0 : index
    %c0_5 = arith.constant 0 : index
    %4 = vector.load %arg4[%c0_4, %c0_5] : memref<5x32xf32, #tpu.memory_space<vmem>>, vector<1x32xf32>
    %c1 = arith.constant 1 : index
    %c0_6 = arith.constant 0 : index
    %5 = vector.load %arg4[%c1, %c0_6] : memref<5x32xf32, #tpu.memory_space<vmem>>, vector<1x32xf32>
    %c2 = arith.constant 2 : index
    %c0_7 = arith.constant 0 : index
    %6 = vector.load %arg4[%c2, %c0_7] : memref<5x32xf32, #tpu.memory_space<vmem>>, vector<1x4xf32>
    %c3 = arith.constant 3 : index
    %c0_8 = arith.constant 0 : index
    %7 = vector.load %arg4[%c3, %c0_8] : memref<5x32xf32, #tpu.memory_space<vmem>>, vector<1x4xf32>
    %c4 = arith.constant 4 : index
    %c0_9 = arith.constant 0 : index
    %8 = vector.load %arg4[%c4, %c0_9] : memref<5x32xf32, #tpu.memory_space<vmem>>, vector<1x4xf32>
    %cst = arith.constant dense<0.000000e+00> : vector<2x32xf32>
    %9 = tpu.matmul %1, %2, %cst {dimension_numbers = #tpu.dot_dimension_numbers<[1], [0], [0], [1], [0, 0, 1, 1], [], []>} : vector<2x16xbf16>, vector<16x32xbf16>, vector<2x32xf32> -> vector<2x32xf32>
    %10 = vector.broadcast %4 : vector<1x32xf32> to vector<2x32xf32>
    %11 = arith.addf %9, %10 : vector<2x32xf32>
    %cst_10 = arith.constant 0.000000e+00 : f32
    %12 = vector.broadcast %cst_10 : f32 to vector<2x32xf32>
    %13 = arith.maximumf %11, %12 : vector<2x32xf32>
    %14 = arith.truncf %13 : vector<2x32xf32> to vector<2x32xbf16>
    %cst_11 = arith.constant dense<0.000000e+00> : vector<2x32xf32>
    %15 = tpu.matmul %14, %3, %cst_11 {dimension_numbers = #tpu.dot_dimension_numbers<[1], [0], [0], [1], [0, 0, 1, 1], [], []>} : vector<2x32xbf16>, vector<32x32xbf16>, vector<2x32xf32> -> vector<2x32xf32>
    %16 = vector.broadcast %5 : vector<1x32xf32> to vector<2x32xf32>
    %17 = arith.addf %15, %16 : vector<2x32xf32>
    %cst_12 = arith.constant 0.000000e+00 : f32
    %18 = vector.broadcast %cst_12 : f32 to vector<2x32xf32>
    %19 = arith.maximumf %17, %18 : vector<2x32xf32>
    %20 = arith.truncf %19 : vector<2x32xf32> to vector<2x32xbf16>
    %c0_13 = arith.constant 0 : index
    %c0_14 = arith.constant 0 : index
    %21 = vector.load %arg3[%c0_13, %c0_14] : memref<32x4xbf16, #tpu.memory_space<vmem>>, vector<32x4xbf16>
    %cst_15 = arith.constant dense<0.000000e+00> : vector<2x4xf32>
    %22 = tpu.matmul %20, %21, %cst_15 {dimension_numbers = #tpu.dot_dimension_numbers<[1], [0], [0], [1], [0, 0, 1, 1], [], []>} : vector<2x32xbf16>, vector<32x4xbf16>, vector<2x4xf32> -> vector<2x4xf32>
    %23 = vector.broadcast %6 : vector<1x4xf32> to vector<2x4xf32>
    %24 = arith.addf %22, %23 : vector<2x4xf32>
    %25 = math.tanh %24 : vector<2x4xf32>
    %26 = vector.broadcast %7 : vector<1x4xf32> to vector<2x4xf32>
    %27 = arith.mulf %25, %26 : vector<2x4xf32>
    %28 = vector.broadcast %8 : vector<1x4xf32> to vector<2x4xf32>
    %29 = arith.addf %27, %28 : vector<2x4xf32>
    %c0_16 = arith.constant 0 : index
    %c0_17 = arith.constant 0 : index
    %30 = vector.load %arg5[%c0_16, %c0_17] : memref<2x4xf32, #tpu.memory_space<vmem>>, vector<2x4xf32>
    tpu.vector_store %arg5[%c0_16, %c0_17], %29 {strides = array<i32>} : memref<2x4xf32, #tpu.memory_space<vmem>>, vector<2x4xf32>,
    return
  }
  func.func @transform_0(%arg0: i32) -> (i32, i32) {
    %c0_i32 = arith.constant 0 : i32
    %c0_i32_0 = arith.constant 0 : i32
    return %arg0, %c0_i32 : i32, i32
  }
  func.func @transform_1(%arg0: i32) -> (i32, i32) {
    %c0_i32 = arith.constant 0 : i32
    %c0_i32_0 = arith.constant 0 : i32
    %c0_i32_1 = arith.constant 0 : i32
    return %c0_i32, %c0_i32_0 : i32, i32
  }
  func.func @transform_2(%arg0: i32) -> (i32, i32) {
    %c0_i32 = arith.constant 0 : i32
    %c0_i32_0 = arith.constant 0 : i32
    %c0_i32_1 = arith.constant 0 : i32
    return %c0_i32, %c0_i32_0 : i32, i32
  }
  func.func @transform_3(%arg0: i32) -> (i32, i32) {
    %c0_i32 = arith.constant 0 : i32
    %c0_i32_0 = arith.constant 0 : i32
    %c0_i32_1 = arith.constant 0 : i32
    return %c0_i32, %c0_i32_0 : i32, i32
  }
  func.func @transform_4(%arg0: i32) -> (i32, i32) {
    %c0_i32 = arith.constant 0 : i32
    %c0_i32_0 = arith.constant 0 : i32
    return %arg0, %c0_i32 : i32, i32
  }
}

</mosaic_0001>

<bundles_post_ra>
// kernel: _forward_impl.1
= control target key start
LH: loop header
LB: loop body
LE: loop exit
PB: predicated region body
PF: predicated region fallthrough
CT: control target
= control target key end

     0   :  { %9 = vsyncpa [#allocation3], 0  ;;  %s510_s0 = inlined_call_operand.hbm [shape: f32[2,16], index: 0, kind: input, shape index: {}]   ;;  %s511_s1 = inlined_call_operand.hbm [shape: bf16[48,32], index: 1, kind: input, shape index: {}]   ;;  %s512_s2 = inlined_call_operand.hbm [shape: bf16[32,4], index: 2, kind: input, shape index: {}]   ;;  %s513_s3 = inlined_call_operand.hbm [shape: f32[5,32], index: 3, kind: input, shape index: {}]   ;;  %s514_s4 = inlined_call_operand.hbm [shape: f32[2,4], index: 4, kind: output, shape index: {}]  }
   0x1   :  { %10 = vsyncpa [#allocation6], 0 }
   0x2   :  { %11 = vsyncpa [#allocation9], 0 }
   0x3   :  { %12 = vsyncpa [#allocation4], 0  ;;  %s461_s15 = smov [#allocation5]  }
   0x4   :  { %s28_s16 = sshll.u32 %s461_s15, 4  ;;  %s29_s16 = int_to_ptr.vmem [resolvable:$true] %s28_s16 }
   0x5   :  { %s361_s17 = scalar_lea.vmem %s29_s16, 384  ;;  %p366_p1 = scmp.lt.s32.totalorder %s29_s16, %s29_s16 }
   0x6   :  { %p362_p0 = scmp.ne.s32.totalorder %s29_s16, %s361_s17  ;;  %p367_p2 = scmp.lt.s32.totalorder %s361_s17, %s361_s17 }
   0x8   :  { %p368_p3 = por %p367_p2, %p366_p1 }
   0xa   :  { %p369_p4 = pnand %p368_p3, %p362_p0 }
   0xc   :  { %372 = shalt.err (!%p369_p4)
}
   0xd   :  { %s462_s18 = smov 64   ;;  %s463_s19 = smov 4  }
   0xe   :  { %34 = dma.hbm_to_vmem [thread:$0]  %s511_s1, 384, %s29_s16, [#allocation6], %s462_s18, %s462_s18, %s463_s19  }
   0xf   :  { %s464_s22 = smov [#allocation2]   ;;  %s465_s24 = smov [#allocation7]  }
  0x10   :  { %s19_s23 = sshll.u32 %s464_s22, 4  ;;  %s40_s25 = sshll.u32 %s465_s24, 4  ;;  %s20_s23 = int_to_ptr.vmem [resolvable:$true] %s19_s23  ;;  %s41_s25 = int_to_ptr.vmem [resolvable:$true] %s40_s25 }
  0x11   :  { %s381_s26 = scalar_lea.vmem %s20_s23, 32  ;;  %p386_p6 = scmp.lt.s32.totalorder %s20_s23, %s20_s23 }
  0x12   :  { %p382_p5 = scmp.ne.s32.totalorder %s20_s23, %s381_s26  ;;  %p387_p7 = scmp.lt.s32.totalorder %s381_s26, %s381_s26 }
  0x14   :  { %p388_p8 = por %p387_p7, %p386_p6 }
  0x16   :  { %p389_p9 = pnand %p388_p8, %p382_p5 }
  0x18   :  { %392 = shalt.err (!%p389_p9)
}
  0x19   :  { %22 = dma.hbm_to_vmem [thread:$0]  %s510_s0, 32, %s20_s23, [#allocation3]  }
  0x1a   :  { %s401_s29 = scalar_lea.vmem %s41_s25, 256  ;;  %p406_p11 = scmp.lt.s32.totalorder %s41_s25, %s41_s25 }
  0x1b   :  { %p402_p10 = scmp.ne.s32.totalorder %s41_s25, %s401_s29  ;;  %p407_p12 = scmp.lt.s32.totalorder %s401_s29, %s401_s29 }
  0x1d   :  { %p408_p13 = por %p407_p12, %p406_p11 }
  0x1f   :  { %p409_p0 = pnand %p408_p13, %p402_p10 }
  0x21   :  { %412 = shalt.err (!%p409_p0)
}
  0x22   :  { %46 = dma.hbm_to_vmem [thread:$0]  %s512_s2, 256, %s41_s25, [#allocation6], %s462_s18, %s462_s18, %s463_s19  }
  0x23   :  { %s466_s5 = smov [#allocation8]  }
  0x24   :  { %s53_s6 = sshll.u32 %s466_s5, 4  ;;  %s54_s6 = int_to_ptr.vmem [resolvable:$true] %s53_s6 }
  0x25   :  { %s421_s7 = scalar_lea.vmem %s54_s6, 128  ;;  %p426_p2 = scmp.lt.s32.totalorder %s54_s6, %s54_s6 }
  0x26   :  { %p422_p1 = scmp.ne.s32.totalorder %s54_s6, %s421_s7  ;;  %p427_p3 = scmp.lt.s32.totalorder %s421_s7, %s421_s7 }
  0x28   :  { %p428_p4 = por %p427_p3, %p426_p2 }
  0x2a   :  { %p429_p5 = pnand %p428_p4, %p422_p1 }
  0x2c   :  { %432 = shalt.err (!%p429_p5)
}
  0x2d   :  { %56 = dma.hbm_to_vmem [thread:$0]  %s513_s3, 128, %s54_s6, [#allocation9]  }
  0x2e   :  { %453 = dma.done.wait [#allocation3], 32  }
  0x2f   :  { %454 = vsyncadd [#allocation3], 4294967264 }
  0x30   :  { %455 = dma.done.wait [#allocation6], 640  }
  0x31   :  { %456 = vsyncadd [#allocation6], 4294966656 }
  0x32   :  { %457 = dma.done.wait [#allocation9], 128  }
  0x33   :  { %458 = vsyncadd [#allocation9], 4294967168  ;;  %v467_v0 = vmov 0.0   ;;  %vm468_vm0 = vmmov 0   ;;  %v346_v1 = vld [vmem:[#allocation5] sm:$0xff]   ;;  %vm93_vm1 = vcmask 130048  }
  0x34   :  { %315 = vmatprep.subr.bf16.mxu0 %v467_v0  ;;  %317 = vmatprep.mubr.msk.bf16.mxu0 %vm468_vm0, %v467_v0  ;;  %v70_v2 = vld [vmem:[#allocation2] sm:$0x3]  ;;  %v347_v4 = vld [vmem:[#allocation5 + $0x10] sm:$0xff]   ;;  %v348_v5 = vld [vmem:[#allocation5 + $0x8] sm:$0xff]   ;;  %vm155_vm2 = vcmask 261120   ;;  %s469_s2 = smov [#allocation10]  }
  0x35   :  { %321 = vmatprep.subr.bf16.mxu1 %v467_v0  ;;  %325 = vmatprep.mubr.msk.bf16.mxu1 %vm468_vm0, %v467_v0  ;;  %v71_v3 = vpack.c.bf16 %v70_v2, %v70_v2  ;;  %v349_v6 = vld [vmem:[#allocation7 + $0x8] sm:$0xff]   ;;  %v294_v7 = vld [vmem:[#allocation8] ss:$0 sm:$0xff]  ;;  %v350_v15 = vld [vmem:[#allocation7] sm:$0xff]   ;;  %s283_s3 = sshll.u32 %s469_s2, 4  ;;  %vm275_vm3 = vcmask 25600   ;;  %s284_s3 = int_to_ptr.vmem [resolvable:$true] %s283_s3 }
  0x36   :  { %316 = vmatpush3.bf16.msra.mxu0 %v346_v1  ;;  %322 = vmatpush3.bf16.msra.mxu1 %v347_v4  ;;  %v297_v16 = vld [vmem:[#allocation8 + $0x1] ss:$0 sm:$0xff]  ;;  %v301_v24 = vld [vmem:[#allocation8 + $0x2] ss:$0 sm:$0xff]  ;;  %v305_v30 = vld [vmem:[#allocation8 + $0x3] ss:$0 sm:$0xff]  ;;  %p438_p7 = scmp.lt.s32.totalorder %s284_s3, %s284_s3 }
  0x37   :  { %329 = vmatprep.subr.bf16.mxu0 %v467_v0  ;;  %323 = vmatprep.subr.bf16.mxu1 %v467_v0  ;;  %v306_v32 = vld [vmem:[#allocation8 + $0x4] ss:$0 sm:$0xff]  ;;  %s433_s9 = scalar_lea.vmem %s284_s3, 32 }
  0x38   :  { %p434_p6 = scmp.ne.s32.totalorder %s284_s3, %s433_s9  ;;  %p439_p8 = scmp.lt.s32.totalorder %s433_s9, %s433_s9 }
  0x39   :  { %318 = vmatmul.mubr.msk.bf16.vlgmr.msra.gmra.mxu0 %vm93_vm1, %v71_v3 }
  0x3a   :  { %333 = vmatprep.mubr.msk.bf16.mxu0 %vm468_vm0, %v467_v0  ;;  %324 = vmatpush3.bf16.msra.mxu1 %v348_v5  ;;  %p440_p9 = por %p439_p8, %p438_p7 }
  0x3b   :  { %330 = vmatpush3.bf16.msra.mxu0 %v349_v6 }
  0x3c   :  { %331 = vmatprep.subr.bf16.mxu0 %v467_v0  ;;  %p441_p10 = pnand %p440_p9, %p434_p6 }
  0x3f   :  { %332 = vmatpush3.bf16.msra.mxu0 %v350_v15 }
  0xf9   :  { %v131_v8 = vpop.f32.mrf.mxu0 }
  0xfa   :  { %v132_v9 = vadd.f32 %v294_v7, %v131_v8 }
  0xfb   :  { %v319_v10 = vpop.f32.mrf.mxu0 }
  0xfc   :  { %v137_v11 = vmax.f32 %v132_v9, 0.0 }
  0xfd   :  { %v134_v12 = vpop.f32.mrf.mxu0 }
  0xfe   :  { %v138_v13 = vpack.c.bf16 %v137_v11, %v137_v11 }
  0xff   :  { %v320_v14 = vpop.f32.mrf.mxu0 }
 0x100   :  { %326 = vmatmul.mubr.msk.bf16.vlgmr.msra.gmra.mxu1 %vm155_vm2, %v138_v13 }
 0x1c0   :  { %v193_v17 = vpop.f32.mrf.mxu1 }
 0x1c1   :  { %v194_v18 = vadd.f32 %v297_v16, %v193_v17 }
 0x1c2   :  { %v327_v19 = vpop.f32.mrf.mxu1 }
 0x1c3   :  { %v199_v20 = vmax.f32 %v194_v18, 0.0 }
 0x1c4   :  { %v196_v21 = vpop.f32.mrf.mxu1 }
 0x1c5   :  { %v200_v22 = vpack.c.bf16 %v199_v20, %v199_v20 }
 0x1c6   :  { %v328_v23 = vpop.f32.mrf.mxu1 }
 0x1c7   :  { %334 = vmatmul.mubr.msk.bf16.vlgmr.msra.gmra.mxu0 %vm155_vm2, %v200_v22 }
 0x287   :  { %v258_v25 = vpop.f32.mrf.mxu0 }
 0x288   :  { %v259_v26 = vadd.f32 %v301_v24, %v258_v25 }
 0x289   :  { %v335_v27 = vpop.f32.mrf.mxu0 }
 0x28a   :  { %351 = vtanh.f32 %v259_v26 }
 0x28b   :  { %v261_v28 = vpop.f32.mrf.mxu0 }
 0x28d   :  { %v336_v29 = vpop.f32.mrf.mxu0 }
 0x297   :  { %v352_v31 = vpop.eup %351 }
 0x298   :  { %v269_v33 = vmul.f32 %v352_v31, %v305_v30 }
 0x29a   :  { %v274_v34 = vadd.f32 %v306_v32, %v269_v33 }
 0x29c   :  { %276 = vst.msk [vmem:[#allocation10] sm:$0x3] %vm275_vm3, %v274_v34 }
 0x29d   :  { %444 = shalt.err (!%p441_p10)
}
 0x29e   :  { %286 = dma.vmem_to_hbm [thread:$0]  %s284_s3, 32, %s514_s4, [#allocation4]  }
 0x29f   :  { %459 = dma.done.wait [#allocation4], 32  }
 0x2a0   :  { %460 = vsyncadd [#allocation4], 4294967264 }
 0x2a1   :  { %290 = vsyncpa [#allocation3], 1 }
 0x2a2   :  { %291 = vsyncpa [#allocation6], 1 }
 0x2a3   :  { %292 = vsyncpa [#allocation9], 1 }
 0x2a4   :  { %293 = vsyncpa [#allocation4], 1 }

</bundles_post_ra>
